<compile_context>
chip_gen: v7x
topology: tpu7x:2x2x1
jax: 0.10.0
libtpu: 0.0.40
codegen_flags: <defaults>
</compile_context>

<pallas_src>
import jax
import jax.numpy as jnp
from jax import lax
from jax.experimental import pallas as pl
from jax.experimental.pallas import tpu as pltpu


def _round_up(x, m):
    return ((x + m - 1) // m) * m


def adaptive_concat_pool1d(x, size=None, *, row_tile=256, len_tile=2048):
    """Pallas TPU AdaptiveConcatPool1d.

    x: (N, C, L) array. Returns (N, 2*C, 1): [max over L ; mean over L]
    concatenated along the channel axis (max first), matching the PyTorch module.
    """
    size = size or 1
    if size != 1:
        # TODO(synk): general adaptive pooling (size > 1) with torch's floor/ceil
        # window boundaries is not implemented; the module default (size=1) is a
        # full-length reduction.
        raise NotImplementedError("Only size=1 is supported.")

    n, c, length = x.shape
    rows = n * c
    x2 = x.reshape(rows, length)  # contiguous reshape, free

    # Tile sizes: use full-extent blocks for small dims (always legal), otherwise
    # hardware-aligned tiles (sublane multiple for rows, 128 lanes for length).
    sublane = {1: 32, 2: 16, 4: 8}.get(jnp.dtype(x.dtype).itemsize, 8)
    tr = rows if rows <= row_tile else _round_up(row_tile, sublane)
    tl = length if length <= len_tile else _round_up(len_tile, 128)

    grid = (pl.cdiv(rows, tr), pl.cdiv(length, tl))
    ragged_l = (length % tl) != 0
    inv_len = 1.0 / float(length)

    def kernel(x_ref, o_ref, max_acc, sum_acc):
        l = pl.program_id(1)

        @pl.when(l == 0)
        def _init():
            max_acc[...] = jnp.full_like(max_acc, -jnp.inf)
            sum_acc[...] = jnp.zeros_like(sum_acc)

        xt = x_ref[...].astype(jnp.float32)  # (tr, tl)
        if ragged_l:
            # Mask out-of-range columns of the (padded) last L tile.
            col = l * tl + lax.broadcasted_iota(jnp.int32, xt.shape, 1)
            valid = col < length
            xt_max = jnp.where(valid, xt, -jnp.inf)
            xt_sum = jnp.where(valid, xt, 0.0)
        else:
            xt_max = xt
            xt_sum = xt

        # Elementwise (VPU) accumulation across L tiles; XLU reduce happens only
        # once per row block in the finalize branch below.
        max_acc[...] = jnp.maximum(max_acc[...], xt_max)
        sum_acc[...] = sum_acc[...] + xt_sum

        @pl.when(l == pl.num_programs(1) - 1)
        def _finalize():
            row_max = jnp.max(max_acc[...], axis=-1)            # (tr,)
            row_mean = jnp.sum(sum_acc[...], axis=-1) * inv_len  # true-L mean, f32
            o_ref[0, :] = row_max.astype(o_ref.dtype)
            o_ref[1, :] = row_mean.astype(o_ref.dtype)

    out = pl.pallas_call(
        kernel,
        out_shape=jax.ShapeDtypeStruct((2, rows), x.dtype),
        grid_spec=pltpu.PrefetchScalarGridSpec(
            num_scalar_prefetch=0,
            grid=grid,
            in_specs=[pl.BlockSpec((tr, tl), lambda r, l: (r, l))],
            out_specs=pl.BlockSpec((2, tr), lambda r, l: (0, r)),
            scratch_shapes=[
                pltpu.VMEM((tr, tl), jnp.float32),  # running max
                pltpu.VMEM((tr, tl), jnp.float32),  # running sum
            ],
        ),
        compiler_params=pltpu.CompilerParams(
            dimension_semantics=("parallel", "arbitrary"),
            vmem_limit_bytes=64 << 20,
        ),
    )(x2)

    # (2, N*C) lane-dense kernel output -> (N, 2C, 1): max channels then mean.
    out = out.reshape(2, n, c)
    return jnp.concatenate([out[0], out[1]], axis=1)[..., None]


def _reference(x):
    return jnp.concatenate(
        [jnp.max(x, axis=-1, keepdims=True), jnp.mean(x, axis=-1, keepdims=True)],
        axis=1,
    )


if __name__ == "__main__":
    key = jax.random.PRNGKey(0)
    k1, k2 = jax.random.split(key)

    # Small NCL input consistent with the module: batch=2, channels=4, length=16.
    x = jax.random.normal(k1, (2, 4, 16), dtype=jnp.float32)
    out = jax.block_until_ready(adaptive_concat_pool1d(x))
    ref = _reference(x)
    assert out.shape == (2, 8, 1), out.shape
    assert jnp.allclose(out, ref, atol=1e-5, rtol=1e-5), "mismatch vs reference (small)"

    # Ragged / multi-tile path: length not a multiple of the L tile, several L steps.
    xb = jax.random.normal(k2, (2, 3, 300), dtype=jnp.float32)
    outb = jax.block_until_ready(adaptive_concat_pool1d(xb, len_tile=128))
    refb = _reference(xb)
    assert outb.shape == (2, 6, 1), outb.shape
    assert jnp.allclose(outb, refb, atol=1e-5, rtol=1e-5), "mismatch vs reference (ragged)"

    print("KERNEL_OK")
</pallas_src>

<mosaic_0001>
module attributes {stable_mosaic.version = 11 : i64} {
  func.func @kernel(%arg0: i32, %arg1: i32, %arg2: memref<8x16xf32, #tpu.memory_space<vmem>>, %arg3: memref<2x8xf32, #tpu.memory_space<vmem>>, %arg4: memref<8x16xf32, #tpu.memory_space<vmem>>, %arg5: memref<8x16xf32, #tpu.memory_space<vmem>>) attributes {dimension_semantics = [#tpu.dimension_semantics<parallel>, #tpu.dimension_semantics<arbitrary>], iteration_bounds = array<i64: 1, 1>, scalar_prefetch = 0 : i64, scratch_operands = 2 : i64, tpu.core_type = #tpu.core_type<tc>, window_params = [{transform_indices = @transform_0, window_bounds = array<i64: 8, 16>}, {transform_indices = @transform_1, window_bounds = array<i64: 2, 8>}]} {
    %c0_i32 = arith.constant 0 : i32
    %0 = arith.cmpi eq, %arg1, %c0_i32 : i32
    %1 = arith.extui %0 : i1 to i32
    %c0_i32_0 = arith.constant 0 : i32
    %2 = arith.cmpi ne, %1, %c0_i32_0 : i32
    scf.if %2 {
      %cst = arith.constant 0xFF800000 : f32
      %13 = vector.broadcast %cst : f32 to vector<8x16xf32>
      %c0_12 = arith.constant 0 : index
      %c0_13 = arith.constant 0 : index
      %14 = vector.load %arg4[%c0_12, %c0_13] : memref<8x16xf32, #tpu.memory_space<vmem>>, vector<8x16xf32>
      tpu.vector_store %arg4[%c0_12, %c0_13], %13 {strides = array<i32>} : memref<8x16xf32, #tpu.memory_space<vmem>>, vector<8x16xf32>,
      %cst_14 = arith.constant 0.000000e+00 : f32
      %15 = vector.broadcast %cst_14 : f32 to vector<8x16xf32>
      %c0_15 = arith.constant 0 : index
      %c0_16 = arith.constant 0 : index
      %16 = vector.load %arg5[%c0_15, %c0_16] : memref<8x16xf32, #tpu.memory_space<vmem>>, vector<8x16xf32>
      tpu.vector_store %arg5[%c0_15, %c0_16], %15 {strides = array<i32>} : memref<8x16xf32, #tpu.memory_space<vmem>>, vector<8x16xf32>,
    } else {
    }
    %c0 = arith.constant 0 : index
    %c0_1 = arith.constant 0 : index
    %3 = vector.load %arg2[%c0, %c0_1] : memref<8x16xf32, #tpu.memory_space<vmem>>, vector<8x16xf32>
    %c0_2 = arith.constant 0 : index
    %c0_3 = arith.constant 0 : index
    %4 = vector.load %arg4[%c0_2, %c0_3] : memref<8x16xf32, #tpu.memory_space<vmem>>, vector<8x16xf32>
    %5 = arith.maximumf %4, %3 : vector<8x16xf32>
    %c0_4 = arith.constant 0 : index
    %c0_5 = arith.constant 0 : index
    %6 = vector.load %arg4[%c0_4, %c0_5] : memref<8x16xf32, #tpu.memory_space<vmem>>, vector<8x16xf32>
    tpu.vector_store %arg4[%c0_4, %c0_5], %5 {strides = array<i32>} : memref<8x16xf32, #tpu.memory_space<vmem>>, vector<8x16xf32>,
    %c0_6 = arith.constant 0 : index
    %c0_7 = arith.constant 0 : index
    %7 = vector.load %arg5[%c0_6, %c0_7] : memref<8x16xf32, #tpu.memory_space<vmem>>, vector<8x16xf32>
    %8 = arith.addf %7, %3 : vector<8x16xf32>
    %c0_8 = arith.constant 0 : index
    %c0_9 = arith.constant 0 : index
    %9 = vector.load %arg5[%c0_8, %c0_9] : memref<8x16xf32, #tpu.memory_space<vmem>>, vector<8x16xf32>
    tpu.vector_store %arg5[%c0_8, %c0_9], %8 {strides = array<i32>} : memref<8x16xf32, #tpu.memory_space<vmem>>, vector<8x16xf32>,
    %c0_i32_10 = arith.constant 0 : i32
    %10 = arith.cmpi eq, %arg1, %c0_i32_10 : i32
    %11 = arith.extui %10 : i1 to i32
    %c0_i32_11 = arith.constant 0 : i32
    %12 = arith.cmpi ne, %11, %c0_i32_11 : i32
    scf.if %12 {
      %c0_12 = arith.constant 0 : index
      %c0_13 = arith.constant 0 : index
      %13 = vector.load %arg4[%c0_12, %c0_13] : memref<8x16xf32, #tpu.memory_space<vmem>>, vector<8x16xf32>
      %cst = arith.constant dense<0xFF800000> : vector<8xf32>
      %14 = vector.multi_reduction <maximumf>, %13, %cst [1] : vector<8x16xf32> to vector<8xf32>
      %c0_14 = arith.constant 0 : index
      %c0_15 = arith.constant 0 : index
      %15 = vector.load %arg5[%c0_14, %c0_15] : memref<8x16xf32, #tpu.memory_space<vmem>>, vector<8x16xf32>
      %cst_16 = arith.constant dense<0.000000e+00> : vector<8xf32>
      %16 = vector.multi_reduction <add>, %15, %cst_16 [1] : vector<8x16xf32> to vector<8xf32>
      %cst_17 = arith.constant 6.250000e-02 : f32
      %17 = vector.broadcast %cst_17 : f32 to vector<8xf32>
      %18 = arith.mulf %16, %17 : vector<8xf32>
      %c0_18 = arith.constant 0 : index
      %c0_19 = arith.constant 0 : index
      %19 = vector.load %arg3[%c0_18, %c0_19] : memref<2x8xf32, #tpu.memory_space<vmem>>, vector<1x8xf32>
      %20 = vector.shape_cast %19 : vector<1x8xf32> to vector<8xf32>
      %21 = vector.shape_cast %14 : vector<8xf32> to vector<1x8xf32>
      tpu.vector_store %arg3[%c0_18, %c0_19], %21 {strides = array<i32>} : memref<2x8xf32, #tpu.memory_space<vmem>>, vector<1x8xf32>,
      %c1 = arith.constant 1 : index
      %c0_20 = arith.constant 0 : index
      %22 = vector.load %arg3[%c1, %c0_20] : memref<2x8xf32, #tpu.memory_space<vmem>>, vector<1x8xf32>
      %23 = vector.shape_cast %22 : vector<1x8xf32> to vector<8xf32>
      %24 = vector.shape_cast %18 : vector<8xf32> to vector<1x8xf32>
      tpu.vector_store %arg3[%c1, %c0_20], %24 {strides = array<i32>} : memref<2x8xf32, #tpu.memory_space<vmem>>, vector<1x8xf32>,
    } else {
    }
    return
  }
  func.func @transform_0(%arg0: i32, %arg1: i32) -> (i32, i32) {
    %c0_i32 = arith.constant 0 : i32
    return %arg0, %arg1 : i32, i32
  }
  func.func @transform_1(%arg0: i32, %arg1: i32) -> (i32, i32) {
    %c0_i32 = arith.constant 0 : i32
    %c0_i32_0 = arith.constant 0 : i32
    return %c0_i32, %arg0 : i32, i32
  }
}

</mosaic_0001>

<bundles_post_ra>
// kernel: tpu_custom_call.1
= control target key start
LH: loop header
LB: loop body
LE: loop exit
PB: predicated region body
PF: predicated region fallthrough
CT: control target
= control target key end

     0   :  { %6 = vsyncpa [#allocation5], 0  ;;  %s176_s0 = inlined_call_operand.hbm [shape: f32[8,16], index: 0, kind: input, shape index: {}]   ;;  %s177_s1 = inlined_call_operand.hbm [shape: f32[2,8], index: 1, kind: output, shape index: {}]  }
   0x1   :  { %7 = vsyncpa [#allocation6], 0  ;;  %s132_s6 = smov [#allocation4]   ;;  %s84_s10 = scalar_lea.hbm %s176_s0, 128 }
   0x2   :  { %s14_s7 = sshll.u32 %s132_s6, 4  ;;  %p85_p0 = scmp.ne.s32.totalorder %s176_s0, %s84_s10  ;;  %s15_s7 = int_to_ptr.vmem [resolvable:$true] %s14_s7 }
   0x3   :  { %p88_p1 = scmp.lt.u32.totalorder %s84_s10, %s176_s0 }
   0x5   :  { %p90_p2 = pnand %p88_p1, %p85_p0 }
   0x7   :  { %93 = shalt.err (!%p90_p2)
}
   0x8   :  { %s94_s15 = scalar_lea.vmem %s15_s7, 128  ;;  %p99_p4 = scmp.lt.s32.totalorder %s15_s7, %s15_s7 }
   0x9   :  { %p95_p3 = scmp.ne.s32.totalorder %s15_s7, %s94_s15  ;;  %p100_p5 = scmp.lt.s32.totalorder %s94_s15, %s94_s15 }
   0xb   :  { %p101_p6 = por %p100_p5, %p99_p4 }
   0xd   :  { %p102_p7 = pnand %p101_p6, %p95_p3 }
   0xf   :  { %105 = shalt.err (!%p102_p7)
}
  0x10   :  { %17 = dma.hbm_to_vmem [thread:$0]  %s176_s0, 128, %s15_s7, [#allocation5]  }
  0x11   :  { %128 = dma.done.wait [#allocation5], 128  }
  0x12   :  { %129 = vsyncadd [#allocation5], 4294967168  ;;  %vm25_vm0 = vcmask 130048   ;;  %v133_v0 = vmov 0.0   ;;  %v134_v1 = vmov -inf   ;;  %v28_v2 = vld [vmem:[#allocation4] sm:$0xff]  ;;  %v49_v11 = vlaneseq }
  0x13   :  { %27 = vst.msk [vmem:[#allocation3] sm:$0xff] %vm25_vm0, %v133_v0  ;;  %26 = vst.msk [vmem:[#allocation2] sm:$0xff] %vm25_vm0, %v134_v1  ;;  %vm56_vm1 = vcmask 57344   ;;  %s135_s0 = smov [#allocation7]  }
  0x14   :  { %v50_v12 = vand.u32 127, %v49_v11  ;;  %v52_v13 = vshrl.u32 %v49_v11, 7  ;;  %s71_s18 = sshll.u32 %s135_s0, 4  ;;  %s72_s18 = int_to_ptr.vmem [resolvable:$true] %s71_s18 }
  0x15   :  { %s106_s19 = scalar_lea.vmem %s72_s18, 32  ;;  %p111_p9 = scmp.lt.s32.totalorder %s72_s18, %s72_s18 }
  0x16   :  { %v53_v14 = vsub.s32 %v50_v12, %v52_v13  ;;  %p107_p8 = scmp.ne.s32.totalorder %s72_s18, %s106_s19  ;;  %p112_p10 = scmp.lt.s32.totalorder %s106_s19, %s106_s19 }
  0x18   :  { %p113_p11 = por %p112_p10, %p111_p9 }
  0x1a   :  { %v33_v3 = vld [vmem:[#allocation3] sm:$0xff]  ;;  %v29_v4 = vld [vmem:[#allocation2] sm:$0xff]  ;;  %p114_p12 = pnand %p113_p11, %p107_p8 }
  0x1b   :  { %v34_v5 = vadd.f32 %v33_v3, %v28_v2  ;;  %v30_v6 = vmax.f32 %v29_v4, %v28_v2 }
  0x1d   :  { %35 = vst.msk [vmem:[#allocation3] sm:$0xff] %vm25_vm0, %v34_v5  ;;  %32 = vst.msk [vmem:[#allocation2] sm:$0xff] %vm25_vm0, %v30_v6 }
  0x24   :  { %v43_v7 = vld [vmem:[#allocation3] sm:$0xff]  ;;  %v39_v8 = vld [vmem:[#allocation2] sm:$0xff] }
  0x25   :  { %v44_v9 = vsel %vm25_vm0, %v43_v7, 0.0  ;;  %v40_v10 = vsel %vm25_vm0, %v39_v8, -inf }
  0x26   :  { %45 = vadd.xlane.f32.xlu0 %v44_v9 }
  0x2a   :  { %41 = vmax.xlane.f32.xlu0 %v40_v10 }
  0xb3   :  { %v46_v15 = vpop.xlane.xlu0 %45 }
  0xb4   :  { %v47_v16 = vmul.f32 0.0625, %v46_v15 }
  0xb6   :  { %v62_v17 = vrot.slane %v47_v16, %v53_v14 }
  0xb7   :  { %v42_v18 = vpop.xlane.xlu0 %41 }
  0xb8   :  { %v54_v19 = vrot.slane %v42_v18, %v53_v14  ;;  %64 = vst.msk [vmem:[#allocation7 + $0x1] sm:$0x1] %vm56_vm1, %v62_v17 }
  0xba   :  { %57 = vst.msk [vmem:[#allocation7] sm:$0x1] %vm56_vm1, %v54_v19 }
  0xbb   :  { %117 = shalt.err (!%p114_p12)
}
  0xbc   :  { %s118_s22 = scalar_lea.hbm %s177_s1, 32 }
  0xbd   :  { %p119_p13 = scmp.ne.s32.totalorder %s177_s1, %s118_s22  ;;  %p122_p0 = scmp.lt.u32.totalorder %s118_s22, %s177_s1 }
  0xbf   :  { %p124_p1 = pnand %p122_p0, %p119_p13 }
  0xc1   :  { %127 = shalt.err (!%p124_p1)
}
  0xc2   :  { %74 = dma.vmem_to_hbm [thread:$0]  %s72_s18, 32, %s177_s1, [#allocation6]  }
  0xc3   :  { %130 = dma.done.wait [#allocation6], 32  }
  0xc4   :  { %131 = vsyncadd [#allocation6], 4294967264 }
  0xc5   :  { %78 = vsyncpa [#allocation5], 1 }
  0xc6   :  { %79 = vsyncpa [#allocation6], 1 }

</bundles_post_ra>
